<compile_context>
chip_gen: v7x
topology: tpu7x:2x2x1
jax: 0.10.0
libtpu: 0.0.40
codegen_flags: <defaults>
</compile_context>

<pallas_src>
import jax
import jax.numpy as jnp
from jax.experimental import pallas as pl
from jax.experimental.pallas import tpu as pltpu


def _round_up(x, m):
    return (x + m - 1) // m * m


def _reconstruction_kernel(x_ref, w1_ref, b1_ref, w2_ref, b2_ref, o_ref):
    # fc1: (TB, Fp) @ (Fp, Hp) on the MXU, bf16 operands, f32 accumulation.
    h = jnp.dot(x_ref[...], w1_ref[...], preferred_element_type=jnp.float32)
    h = h + b1_ref[...]                       # f32 bias add, (1,Hp)->(TB,Hp)
    h = jnp.where(h >= 0.0, h, 0.2 * h)       # LeakyReLU(0.2) in f32 (VPU)

    # fc2: (TB, Hp) @ (Hp, Fp), bf16 operands, f32 accumulation.
    out = jnp.dot(h.astype(jnp.bfloat16), w2_ref[...],
                  preferred_element_type=jnp.float32)
    out = out + b2_ref[...]

    # sigmoid: exp -> EUP, approx reciprocal -> EUP (keeps VALU slot free).
    out = pl.reciprocal(1.0 + jnp.exp(-out), approx=True)
    o_ref[...] = out.astype(o_ref.dtype)


def reconstruction_forward(x, w1, b1, w2, b2, *, block_b=256):
    """x: (B, F); w1: (F, 2F); b1: (2F,); w2: (2F, F); b2: (F,)."""
    B, F = x.shape
    H = w1.shape[1]
    assert w1.shape == (F, H) and w2.shape == (H, F)
    assert b1.shape == (H,) and b2.shape == (F,)

    # Lane-dense padding: last dims -> multiples of 128; batch -> multiple of
    # the batch tile (itself a multiple of 8 sublanes).
    Fp = _round_up(F, 128)
    Hp = _round_up(H, 128)
    TB = min(_round_up(B, 8), block_b)
    Bp = _round_up(B, TB)

    out_dtype = x.dtype
    # Pre-cast MXU operands to bf16 once in the wrapper (halves HBM/VMEM bytes
    # and removes per-tile casts inside the kernel). Biases stay f32.
    xp = jnp.zeros((Bp, Fp), jnp.bfloat16).at[:B, :F].set(
        x.astype(jnp.bfloat16))
    w1p = jnp.zeros((Fp, Hp), jnp.bfloat16).at[:F, :H].set(
        w1.astype(jnp.bfloat16))
    b1p = jnp.zeros((1, Hp), jnp.float32).at[0, :H].set(
        b1.astype(jnp.float32))
    w2p = jnp.zeros((Hp, Fp), jnp.bfloat16).at[:H, :F].set(
        w2.astype(jnp.bfloat16))
    b2p = jnp.zeros((1, Fp), jnp.float32).at[0, :F].set(
        b2.astype(jnp.float32))

    grid = (Bp // TB,)

    cost = pl.CostEstimate(
        flops=2 * Bp * Fp * Hp + 2 * Bp * Hp * Fp,
        transcendentals=Bp * Fp,
        bytes_accessed=(2 * (xp.size + w1p.size + w2p.size)
                        + 4 * (b1p.size + b2p.size)
                        + jnp.dtype(out_dtype).itemsize * Bp * Fp),
    )

    out_p = pl.pallas_call(
        _reconstruction_kernel,
        out_shape=jax.ShapeDtypeStruct((Bp, Fp), out_dtype),
        grid_spec=pltpu.PrefetchScalarGridSpec(
            num_scalar_prefetch=0,
            grid=grid,
            in_specs=[
                pl.BlockSpec((TB, Fp), lambda i: (i, 0)),   # x tile (pipelined)
                pl.BlockSpec((Fp, Hp), lambda i: (0, 0)),   # w1 (resident)
                pl.BlockSpec((1, Hp), lambda i: (0, 0)),    # b1 (resident)
                pl.BlockSpec((Hp, Fp), lambda i: (0, 0)),   # w2 (resident)
                pl.BlockSpec((1, Fp), lambda i: (0, 0)),    # b2 (resident)
            ],
            out_specs=pl.BlockSpec((TB, Fp), lambda i: (i, 0)),
        ),
        compiler_params=pltpu.CompilerParams(
            dimension_semantics=("parallel",),
            vmem_limit_bytes=64 * 1024 * 1024,
        ),
        cost_estimate=cost,
    )(xp, w1p, b1p, w2p, b2p)

    return out_p[:B, :F]


def init_params(key, num_feature):
    """Mirror weights_init: Linear weights ~ N(0, 0.02), biases = 0."""
    k1, k2 = jax.random.split(key)
    F = num_feature
    H = 2 * num_feature
    # stored as (in_features, out_features), i.e. transpose of torch's weight
    w1 = jax.random.normal(k1, (F, H), dtype=jnp.float32) * 0.02
    b1 = jnp.zeros((H,), dtype=jnp.float32)
    w2 = jax.random.normal(k2, (H, F), dtype=jnp.float32) * 0.02
    b2 = jnp.zeros((F,), dtype=jnp.float32)
    return w1, b1, w2, b2


def reference_forward_f32(x, w1, b1, w2, b2):
    h = x @ w1 + b1
    h = jnp.where(h >= 0.0, h, 0.2 * h)
    out = h @ w2 + b2
    return jax.nn.sigmoid(out)


def reference_forward_bf16(x, w1, b1, w2, b2):
    # Mirrors the kernel's bf16-operand / f32-accumulate matmuls.
    h = jnp.dot(x.astype(jnp.bfloat16), w1.astype(jnp.bfloat16),
                preferred_element_type=jnp.float32) + b1
    h = jnp.where(h >= 0.0, h, 0.2 * h)
    out = jnp.dot(h.astype(jnp.bfloat16), w2.astype(jnp.bfloat16),
                  preferred_element_type=jnp.float32) + b2
    return jax.nn.sigmoid(out)


if __name__ == "__main__":
    num_feature = 32
    batch = 8

    key = jax.random.PRNGKey(0)
    kx, kp = jax.random.split(key)
    x = jax.random.normal(kx, (batch, num_feature), dtype=jnp.float32)
    w1, b1, w2, b2 = init_params(kp, num_feature)

    fwd = jax.jit(reconstruction_forward)
    out = jax.block_until_ready(fwd(x, w1, b1, w2, b2))

    assert out.shape == (batch, num_feature)

    # Loose check vs. pure-f32 PyTorch semantics (bf16 MXU operands).
    ref32 = reference_forward_f32(x, w1, b1, w2, b2)
    assert jnp.allclose(out, ref32, atol=2e-2, rtol=2e-2), (
        float(jnp.max(jnp.abs(out - ref32))))

    # Tight check vs. a reference with matching bf16 matmul semantics.
    ref16 = reference_forward_bf16(x, w1, b1, w2, b2)
    assert jnp.allclose(out, ref16, atol=2e-3, rtol=2e-3), (
        float(jnp.max(jnp.abs(out - ref16))))

    print("KERNEL_OK")
</pallas_src>

<mosaic_0001>
module attributes {stable_mosaic.version = 11 : i64} {
  func.func @_reconstruction_kernel(%arg0: i32, %arg1: memref<8x128xbf16, #tpu.memory_space<vmem>>, %arg2: memref<128x128xbf16, #tpu.memory_space<vmem>>, %arg3: memref<1x128xf32, #tpu.memory_space<vmem>>, %arg4: memref<128x128xbf16, #tpu.memory_space<vmem>>, %arg5: memref<1x128xf32, #tpu.memory_space<vmem>>, %arg6: memref<8x128xf32, #tpu.memory_space<vmem>>) attributes {dimension_semantics = [#tpu.dimension_semantics<parallel>], iteration_bounds = array<i64: 1>, scalar_prefetch = 0 : i64, scratch_operands = 0 : i64, tpu.core_type = #tpu.core_type<tc>, window_params = [{transform_indices = @transform_0, window_bounds = array<i64: 8, 128>}, {pipeline_mode = #tpu.pipeline_mode<synchronous>, transform_indices = @transform_1, window_bounds = array<i64: 128, 128>}, {pipeline_mode = #tpu.pipeline_mode<synchronous>, transform_indices = @transform_2, window_bounds = array<i64: 1, 128>}, {pipeline_mode = #tpu.pipeline_mode<synchronous>, transform_indices = @transform_3, window_bounds = array<i64: 128, 128>}, {pipeline_mode = #tpu.pipeline_mode<synchronous>, transform_indices = @transform_4, window_bounds = array<i64: 1, 128>}, {transform_indices = @transform_5, window_bounds = array<i64: 8, 128>}]} {
    %c0 = arith.constant 0 : index
    %c0_0 = arith.constant 0 : index
    %0 = vector.load %arg1[%c0, %c0_0] : memref<8x128xbf16, #tpu.memory_space<vmem>>, vector<8x128xbf16>
    %c0_1 = arith.constant 0 : index
    %c0_2 = arith.constant 0 : index
    %1 = vector.load %arg2[%c0_1, %c0_2] : memref<128x128xbf16, #tpu.memory_space<vmem>>, vector<128x128xbf16>
    %cst = arith.constant dense<0.000000e+00> : vector<8x128xf32>
    %2 = tpu.matmul %0, %1, %cst {dimension_numbers = #tpu.dot_dimension_numbers<[1], [0], [0], [1], [0, 0, 1, 1], [], []>} : vector<8x128xbf16>, vector<128x128xbf16>, vector<8x128xf32> -> vector<8x128xf32>
    %c0_3 = arith.constant 0 : index
    %c0_4 = arith.constant 0 : index
    %3 = vector.load %arg3[%c0_3, %c0_4] : memref<1x128xf32, #tpu.memory_space<vmem>>, vector<1x128xf32>
    %4 = vector.broadcast %3 : vector<1x128xf32> to vector<8x128xf32>
    %5 = arith.addf %2, %4 : vector<8x128xf32>
    %cst_5 = arith.constant 0.000000e+00 : f32
    %6 = vector.broadcast %cst_5 : f32 to vector<8x128xf32>
    %7 = arith.cmpf oge, %5, %6 : vector<8x128xf32>
    %cst_6 = arith.constant 2.000000e-01 : f32
    %8 = vector.broadcast %cst_6 : f32 to vector<8x128xf32>
    %9 = arith.mulf %8, %5 : vector<8x128xf32>
    %10 = arith.select %7, %5, %9 : vector<8x128xi1>, vector<8x128xf32>
    %11 = arith.truncf %10 : vector<8x128xf32> to vector<8x128xbf16>
    %c0_7 = arith.constant 0 : index
    %c0_8 = arith.constant 0 : index
    %12 = vector.load %arg4[%c0_7, %c0_8] : memref<128x128xbf16, #tpu.memory_space<vmem>>, vector<128x128xbf16>
    %cst_9 = arith.constant dense<0.000000e+00> : vector<8x128xf32>
    %13 = tpu.matmul %11, %12, %cst_9 {dimension_numbers = #tpu.dot_dimension_numbers<[1], [0], [0], [1], [0, 0, 1, 1], [], []>} : vector<8x128xbf16>, vector<128x128xbf16>, vector<8x128xf32> -> vector<8x128xf32>
    %c0_10 = arith.constant 0 : index
    %c0_11 = arith.constant 0 : index
    %14 = vector.load %arg5[%c0_10, %c0_11] : memref<1x128xf32, #tpu.memory_space<vmem>>, vector<1x128xf32>
    %15 = vector.broadcast %14 : vector<1x128xf32> to vector<8x128xf32>
    %16 = arith.addf %13, %15 : vector<8x128xf32>
    %cst_12 = arith.constant 0.000000e+00 : f32
    %17 = vector.broadcast %cst_12 : f32 to vector<8x128xf32>
    %18 = arith.subf %17, %16 : vector<8x128xf32>
    %19 = math.exp %18 : vector<8x128xf32>
    %cst_13 = arith.constant 1.000000e+00 : f32
    %20 = vector.broadcast %cst_13 : f32 to vector<8x128xf32>
    %21 = arith.addf %20, %19 : vector<8x128xf32>
    %22 = tpu.reciprocal %21 {approx = true} : vector<8x128xf32> -> vector<8x128xf32>
    %c0_14 = arith.constant 0 : index
    %c0_15 = arith.constant 0 : index
    %23 = vector.load %arg6[%c0_14, %c0_15] : memref<8x128xf32, #tpu.memory_space<vmem>>, vector<8x128xf32>
    tpu.vector_store %arg6[%c0_14, %c0_15], %22 {strides = array<i32>} : memref<8x128xf32, #tpu.memory_space<vmem>>, vector<8x128xf32>,
    return
  }
  func.func @transform_0(%arg0: i32) -> (i32, i32) {
    %c0_i32 = arith.constant 0 : i32
    %c0_i32_0 = arith.constant 0 : i32
    return %arg0, %c0_i32 : i32, i32
  }
  func.func @transform_1(%arg0: i32) -> (i32, i32) {
    %c0_i32 = arith.constant 0 : i32
    %c0_i32_0 = arith.constant 0 : i32
    %c0_i32_1 = arith.constant 0 : i32
    return %c0_i32, %c0_i32_0 : i32, i32
  }
  func.func @transform_2(%arg0: i32) -> (i32, i32) {
    %c0_i32 = arith.constant 0 : i32
    %c0_i32_0 = arith.constant 0 : i32
    %c0_i32_1 = arith.constant 0 : i32
    return %c0_i32, %c0_i32_0 : i32, i32
  }
  func.func @transform_3(%arg0: i32) -> (i32, i32) {
    %c0_i32 = arith.constant 0 : i32
    %c0_i32_0 = arith.constant 0 : i32
    %c0_i32_1 = arith.constant 0 : i32
    return %c0_i32, %c0_i32_0 : i32, i32
  }
  func.func @transform_4(%arg0: i32) -> (i32, i32) {
    %c0_i32 = arith.constant 0 : i32
    %c0_i32_0 = arith.constant 0 : i32
    %c0_i32_1 = arith.constant 0 : i32
    return %c0_i32, %c0_i32_0 : i32, i32
  }
  func.func @transform_5(%arg0: i32) -> (i32, i32) {
    %c0_i32 = arith.constant 0 : i32
    %c0_i32_0 = arith.constant 0 : i32
    return %arg0, %c0_i32 : i32, i32
  }
}

</mosaic_0001>

<bundles_post_ra>
// kernel: reconstruction_forward.1
= control target key start
LH: loop header
LB: loop body
LE: loop exit
PB: predicated region body
PF: predicated region fallthrough
CT: control target
= control target key end

     0   :  { %10 = vsyncpa [#allocation3], 0  ;;  %s692_s0 = inlined_call_operand.hbm [shape: bf16[8,128], index: 0, kind: input, shape index: {}]   ;;  %s693_s1 = inlined_call_operand.hbm [shape: bf16[128,128], index: 1, kind: input, shape index: {}]   ;;  %s694_s2 = inlined_call_operand.hbm [shape: f32[1,128], index: 2, kind: input, shape index: {}]   ;;  %s695_s3 = inlined_call_operand.hbm [shape: bf16[128,128], index: 3, kind: input, shape index: {}]   ;;  %s696_s4 = inlined_call_operand.hbm [shape: f32[1,128], index: 4, kind: input, shape index: {}]   ;;  %s697_s5 = inlined_call_operand.hbm [shape: f32[8,128], index: 5, kind: output, shape index: {}]  }
   0x1   :  { %11 = vsyncpa [#allocation6], 0 }
   0x2   :  { %12 = vsyncpa [#allocation9], 0 }
   0x3   :  { %13 = vsyncpa [#allocation4], 0  ;;  %s580_s18 = smov [#allocation5]   ;;  %s440_s22 = scalar_lea.hbm %s693_s1, 1024 }
   0x4   :  { %s29_s19 = sshll.u32 %s580_s18, 4  ;;  %p441_p0 = scmp.ne.s32.totalorder %s693_s1, %s440_s22  ;;  %s30_s19 = int_to_ptr.vmem [resolvable:$true] %s29_s19 }
   0x5   :  { %p444_p1 = scmp.lt.u32.totalorder %s440_s22, %s693_s1 }
   0x7   :  { %p446_p2 = pnand %p444_p1, %p441_p0 }
   0x9   :  { %449 = shalt.err (!%p446_p2)
}
   0xa   :  { %s450_s27 = scalar_lea.vmem %s30_s19, 1024  ;;  %p455_p4 = scmp.lt.s32.totalorder %s30_s19, %s30_s19 }
   0xb   :  { %p451_p3 = scmp.ne.s32.totalorder %s30_s19, %s450_s27  ;;  %p456_p5 = scmp.lt.s32.totalorder %s450_s27, %s450_s27 }
   0xd   :  { %p457_p6 = por %p456_p5, %p455_p4 }
   0xf   :  { %p458_p7 = pnand %p457_p6, %p451_p3 }
  0x11   :  { %461 = shalt.err (!%p458_p7)
}
  0x12   :  { %s581_s28 = smov 64   ;;  %s582_s29 = smov 4  }
  0x13   :  { %35 = dma.hbm_to_vmem [thread:$0]  %s693_s1, 1024, %s30_s19, [#allocation6], %s581_s28, %s581_s28, %s582_s29  }
  0x14   :  { %s583_s7 = smov [#allocation8]   ;;  %s584_s9 = smov [#allocation2]  }
  0x15   :  { %s51_s8 = sshll.u32 %s583_s7, 4  ;;  %s20_s10 = sshll.u32 %s584_s9, 4  ;;  %s52_s8 = int_to_ptr.vmem [resolvable:$true] %s51_s8  ;;  %s21_s10 = int_to_ptr.vmem [resolvable:$true] %s20_s10 }
  0x16   :  { %s462_s13 = scalar_lea.hbm %s695_s3, 1024 }
  0x17   :  { %p463_p8 = scmp.ne.s32.totalorder %s695_s3, %s462_s13  ;;  %p466_p9 = scmp.lt.u32.totalorder %s462_s13, %s695_s3 }
  0x19   :  { %p468_p10 = pnand %p466_p9, %p463_p8 }
  0x1b   :  { %471 = shalt.err (!%p468_p10)
}
  0x1c   :  { %s472_s1 = scalar_lea.vmem %s52_s8, 1024  ;;  %p477_p12 = scmp.lt.s32.totalorder %s52_s8, %s52_s8 }
  0x1d   :  { %p473_p11 = scmp.ne.s32.totalorder %s52_s8, %s472_s1  ;;  %p478_p13 = scmp.lt.s32.totalorder %s472_s1, %s472_s1 }
  0x1f   :  { %p479_p0 = por %p478_p13, %p477_p12 }
  0x21   :  { %p480_p1 = pnand %p479_p0, %p473_p11 }
  0x23   :  { %483 = shalt.err (!%p480_p1)
}
  0x24   :  { %57 = dma.hbm_to_vmem [thread:$0]  %s695_s3, 1024, %s52_s8, [#allocation9], %s581_s28, %s581_s28, %s582_s29  }
  0x25   :  { %s484_s22 = scalar_lea.hbm %s692_s0, 64 }
  0x26   :  { %p485_p2 = scmp.ne.s32.totalorder %s692_s0, %s484_s22  ;;  %p488_p3 = scmp.lt.u32.totalorder %s484_s22, %s692_s0 }
  0x28   :  { %p490_p4 = pnand %p488_p3, %p485_p2 }
  0x2a   :  { %493 = shalt.err (!%p490_p4)
}
  0x2b   :  { %s494_s27 = scalar_lea.vmem %s21_s10, 64  ;;  %p499_p6 = scmp.lt.s32.totalorder %s21_s10, %s21_s10 }
  0x2c   :  { %p495_p5 = scmp.ne.s32.totalorder %s21_s10, %s494_s27  ;;  %p500_p7 = scmp.lt.s32.totalorder %s494_s27, %s494_s27 }
  0x2e   :  { %p501_p8 = por %p500_p7, %p499_p6 }
  0x30   :  { %p502_p9 = pnand %p501_p8, %p495_p5 }
  0x32   :  { %505 = shalt.err (!%p502_p9)
}
  0x33   :  { %23 = dma.hbm_to_vmem [thread:$0]  %s692_s0, 64, %s21_s10, [#allocation3]  }
  0x34   :  { %s585_s29 = smov [#allocation7]   ;;  %s586_s6 = smov [#allocation10]  }
  0x35   :  { %s42_s30 = sshll.u32 %s585_s29, 4  ;;  %s64_s7 = sshll.u32 %s586_s6, 4  ;;  %s43_s30 = int_to_ptr.vmem [resolvable:$true] %s42_s30  ;;  %s65_s7 = int_to_ptr.vmem [resolvable:$true] %s64_s7 }
  0x36   :  { %s506_s11 = scalar_lea.hbm %s694_s2, 16 }
  0x37   :  { %p507_p10 = scmp.ne.s32.totalorder %s694_s2, %s506_s11  ;;  %p510_p11 = scmp.lt.u32.totalorder %s506_s11, %s694_s2 }
  0x39   :  { %p512_p12 = pnand %p510_p11, %p507_p10 }
  0x3b   :  { %515 = shalt.err (!%p512_p12)
}
  0x3c   :  { %s516_s0 = scalar_lea.vmem %s43_s30, 16  ;;  %s520_s10 = scalar_lea.vmem %s43_s30, 32 }
  0x3d   :  { %p517_p13 = scmp.ne.s32.totalorder %s43_s30, %s516_s0  ;;  %p521_p0 = scmp.lt.s32.totalorder %s43_s30, %s43_s30 }
  0x3e   :  { %p522_p1 = scmp.lt.s32.totalorder %s520_s10, %s516_s0 }
  0x40   :  { %p523_p2 = por %p522_p1, %p521_p0 }
  0x42   :  { %p524_p3 = pnand %p523_p2, %p517_p13 }
  0x44   :  { %527 = shalt.err (!%p524_p3)
}
  0x45   :  { %45 = dma.hbm_to_vmem [thread:$0]  %s694_s2, 16, %s43_s30, [#allocation6]  }
  0x46   :  { %s528_s19 = scalar_lea.hbm %s696_s4, 16 }
  0x47   :  { %p529_p4 = scmp.ne.s32.totalorder %s696_s4, %s528_s19  ;;  %p532_p5 = scmp.lt.u32.totalorder %s528_s19, %s696_s4 }
  0x49   :  { %p534_p6 = pnand %p532_p5, %p529_p4 }
  0x4b   :  { %537 = shalt.err (!%p534_p6)
}
  0x4c   :  { %s538_s24 = scalar_lea.vmem %s65_s7, 16  ;;  %s542_s25 = scalar_lea.vmem %s65_s7, 32 }
  0x4d   :  { %p539_p7 = scmp.ne.s32.totalorder %s65_s7, %s538_s24  ;;  %p543_p8 = scmp.lt.s32.totalorder %s65_s7, %s65_s7 }
  0x4e   :  { %p544_p9 = scmp.lt.s32.totalorder %s542_s25, %s538_s24 }
  0x50   :  { %p545_p10 = por %p544_p9, %p543_p8 }
  0x52   :  { %p546_p11 = pnand %p545_p10, %p539_p7 }
  0x54   :  { %549 = shalt.err (!%p546_p11)
}
  0x55   :  { %67 = dma.hbm_to_vmem [thread:$0]  %s696_s4, 16, %s65_s7, [#allocation9]  }
  0x56   :  { %572 = dma.done.wait [#allocation3], 64  }
  0x57   :  { %573 = vsyncadd [#allocation3], 4294967232 }
  0x58   :  { %574 = dma.done.wait [#allocation6], 1040  }
  0x59   :  { %575 = vsyncadd [#allocation6], 4294966256 }
  0x5a   :  { %576 = dma.done.wait [#allocation9], 1040  }
  0x5b   :  { %577 = vsyncadd [#allocation9], 4294966256  ;;  %v587_v0 = vmov 0.0   ;;  %vm588_vm0 = vmmov 0   ;;  %v420_v1 = vld [vmem:[#allocation5] sm:$0xff]   ;;  %v421_v2 = vld [vmem:[#allocation5 + $0x8] sm:$0xff]  }
  0x5c   :  { %370 = vmatprep.subr.bf16.mxu0 %v587_v0  ;;  %386 = vmatprep.mubr.msk.bf16.mxu0 %vm588_vm0, %v587_v0  ;;  %v422_v3 = vld [vmem:[#allocation5 + $0x10] sm:$0xff]   ;;  %v428_v4 = vld [vmem:[#allocation8] sm:$0xff]   ;;  %v423_v5 = vld [vmem:[#allocation5 + $0x18] sm:$0xff]   ;;  %s589_s4 = smov [#allocation11]  }
  0x5d   :  { %390 = vmatprep.subr.bf16.mxu1 %v587_v0  ;;  %406 = vmatprep.mubr.msk.bf16.mxu1 %vm588_vm0, %v587_v0  ;;  %v429_v6 = vld [vmem:[#allocation8 + $0x8] sm:$0xff]   ;;  %v424_v7 = vld [vmem:[#allocation5 + $0x20] sm:$0xff]   ;;  %v430_v8 = vld [vmem:[#allocation8 + $0x10] sm:$0xff]   ;;  %s323_s27 = sshll.u32 %s589_s4, 4  ;;  %s324_s27 = int_to_ptr.vmem [resolvable:$true] %s323_s27 }
  0x5e   :  { %371 = vmatpush3.bf16.msra.mxu0 %v420_v1  ;;  %391 = vmatpush3.bf16.msra.mxu1 %v428_v4  ;;  %v425_v9 = vld [vmem:[#allocation5 + $0x28] sm:$0xff]   ;;  %v431_v10 = vld [vmem:[#allocation8 + $0x18] sm:$0xff]   ;;  %v426_v11 = vld [vmem:[#allocation5 + $0x30] sm:$0xff]   ;;  %s550_s3 = scalar_lea.vmem %s324_s27, 128  ;;  %p555_p13 = scmp.lt.s32.totalorder %s324_s27, %s324_s27 }
  0x5f   :  { %372 = vmatprep.subr.bf16.mxu0 %v587_v0  ;;  %392 = vmatprep.subr.bf16.mxu1 %v587_v0  ;;  %v432_v12 = vld [vmem:[#allocation8 + $0x20] sm:$0xff]   ;;  %v427_v13 = vld [vmem:[#allocation5 + $0x38] sm:$0xff]   ;;  %v433_v14 = vld [vmem:[#allocation8 + $0x28] sm:$0xff]   ;;  %p551_p12 = scmp.ne.s32.totalorder %s324_s27, %s550_s3  ;;  %p556_p0 = scmp.lt.s32.totalorder %s550_s3, %s550_s3 }
  0x60   :  { %v84_v15 = vld [vmem:[#allocation2] sm:$0xf]  ;;  %v434_v16 = vld [vmem:[#allocation8 + $0x30] sm:$0xff]   ;;  %v334_v18 = vld [vmem:[#allocation7] ss:$0 sm:$0xff] }
  0x61   :  { %v435_v17 = vld [vmem:[#allocation8 + $0x38] sm:$0xff]   ;;  %v343_v27 = vld [vmem:[#allocation10] ss:$0 sm:$0xff]  ;;  %p557_p1 = por %p556_p0, %p555_p13 }
  0x62   :  { %373 = vmatpush3.bf16.msra.mxu0 %v421_v2  ;;  %393 = vmatpush3.bf16.msra.mxu1 %v429_v6 }
  0x63   :  { %374 = vmatprep.subr.bf16.mxu0 %v587_v0  ;;  %394 = vmatprep.subr.bf16.mxu1 %v587_v0  ;;  %p558_p2 = pnand %p557_p1, %p551_p12 }
  0x66   :  { %375 = vmatpush3.bf16.msra.mxu0 %v422_v3  ;;  %395 = vmatpush3.bf16.msra.mxu1 %v430_v8 }
  0x67   :  { %376 = vmatprep.subr.bf16.mxu0 %v587_v0  ;;  %396 = vmatprep.subr.bf16.mxu1 %v587_v0 }
  0x6a   :  { %377 = vmatpush3.bf16.msra.mxu0 %v423_v5  ;;  %397 = vmatpush3.bf16.msra.mxu1 %v431_v10 }
  0x6b   :  { %378 = vmatprep.subr.bf16.mxu0 %v587_v0  ;;  %398 = vmatprep.subr.bf16.mxu1 %v587_v0 }
  0x6e   :  { %379 = vmatpush3.bf16.msra.mxu0 %v424_v7  ;;  %399 = vmatpush3.bf16.msra.mxu1 %v432_v12 }
  0x6f   :  { %380 = vmatprep.subr.bf16.mxu0 %v587_v0  ;;  %400 = vmatprep.subr.bf16.mxu1 %v587_v0 }
  0x72   :  { %381 = vmatpush3.bf16.msra.mxu0 %v425_v9  ;;  %401 = vmatpush3.bf16.msra.mxu1 %v433_v14 }
  0x73   :  { %382 = vmatprep.subr.bf16.mxu0 %v587_v0  ;;  %402 = vmatprep.subr.bf16.mxu1 %v587_v0 }
  0x76   :  { %383 = vmatpush3.bf16.msra.mxu0 %v426_v11  ;;  %403 = vmatpush3.bf16.msra.mxu1 %v434_v16 }
  0x77   :  { %384 = vmatprep.subr.bf16.mxu0 %v587_v0  ;;  %404 = vmatprep.subr.bf16.mxu1 %v587_v0 }
  0x7a   :  { %385 = vmatpush3.bf16.msra.mxu0 %v427_v13  ;;  %405 = vmatpush3.bf16.msra.mxu1 %v435_v17 }
  0x7d   :  { %387 = vmatmul.mubr.bf16.vlgmr.msra.gmra.mrb[0].mxu0 %v84_v15 }
 0x150   :  { %v190_v19 = vpop.f32.mrb[0].mxu0 }
 0x151   :  { %v191_v20 = vadd.f32 %v334_v18, %v190_v19  ;;  %v388_v21 = vpop.f32.mrb[1].mxu0 }
 0x152   :  { %v193_v22 = vpop.f32.mrb[2].mxu0 }
 0x153   :  { %vm196_vm1 = vcmp.ge.f32.partialorder %v191_v20, 0.0  ;;  %v197_v23 = vmul.f32 0.2, %v191_v20  ;;  %v389_v24 = vpop.f32.mrb[3].mxu0 }
 0x155   :  { %v198_v25 = vsel %vm196_vm1, %v191_v20, %v197_v23 }
 0x156   :  { %v199_v26 = vpack.c.bf16 %v198_v25, %v198_v25 }
 0x158   :  { %407 = vmatmul.mubr.bf16.vlgmr.msra.gmra.mrb[0].mxu1 %v199_v26 }
 0x22b   :  { %v305_v28 = vpop.f32.mrb[0].mxu1 }
 0x22c   :  { %v306_v29 = vadd.f32 %v343_v27, %v305_v28  ;;  %v408_v30 = vpop.f32.mrb[1].mxu1 }
 0x22d   :  { %v308_v31 = vpop.f32.mrb[2].mxu1 }
 0x22e   :  { %v311_v32 = vsub.f32 0.0, %v306_v29  ;;  %v409_v33 = vpop.f32.mrb[3].mxu1 }
 0x230   :  { %v312_v34 = vmul.f32 1.442695, %v311_v32 }
 0x232   :  { %436 = vpow2.f32 %v312_v34 }
 0x23c   :  { %v437_v35 = vpop.eup %436 }
 0x23d   :  { %v314_v36 = vadd.f32 1.0, %v437_v35 }
 0x23f   :  { %438 = vrcp.f32 %v314_v36 }
 0x249   :  { %v439_v37 = vpop.eup %438 }
 0x24a   :  { %316 = vst [vmem:[#allocation11] sm:$0xff] %v439_v37 }
 0x24b   :  { %561 = shalt.err (!%p558_p2)
}
 0x24c   :  { %s562_s30 = scalar_lea.hbm %s697_s5, 128 }
 0x24d   :  { %p563_p3 = scmp.ne.s32.totalorder %s697_s5, %s562_s30  ;;  %p566_p4 = scmp.lt.u32.totalorder %s562_s30, %s697_s5 }
 0x24f   :  { %p568_p5 = pnand %p566_p4, %p563_p3 }
 0x251   :  { %571 = shalt.err (!%p568_p5)
}
 0x252   :  { %326 = dma.vmem_to_hbm [thread:$0]  %s324_s27, 128, %s697_s5, [#allocation4]  }
 0x253   :  { %578 = dma.done.wait [#allocation4], 128  }
 0x254   :  { %579 = vsyncadd [#allocation4], 4294967168 }
 0x255   :  { %330 = vsyncpa [#allocation3], 1 }
 0x256   :  { %331 = vsyncpa [#allocation6], 1 }
 0x257   :  { %332 = vsyncpa [#allocation9], 1 }
 0x258   :  { %333 = vsyncpa [#allocation4], 1 }

</bundles_post_ra>
